<compile_context>
chip_gen: v7x
topology: tpu7x:2x2x1
jax: 0.10.0
libtpu: 0.0.40
codegen_flags: <defaults>
</compile_context>

<pallas_src>
import jax
import jax.numpy as jnp
from jax import lax
from jax.experimental import pallas as pl
from jax.experimental.pallas import tpu as pltpu


def _cdiv(a, b):
    return -(-a // b)


def _round_up(a, b):
    return _cdiv(a, b) * b


def _tpu_generation():
    try:
        kind = jax.devices()[0].device_kind.lower()
    except Exception:
        kind = ""
    if "v7" in kind:
        return "v7x"
    if "v6" in kind:
        return "v6e"
    if "v5" in kind:
        return "v5e"
    return "unknown"


def _make_rmse_kernel(*, N, TB, HW, steps, SLAB, needs_mask, unroll):
    n_slabs = TB // SLAB
    group = SLAB // 8

    def kernel(w_ref, p_ref, r_ref, out_ref, acc_ref):
        c = pl.program_id(0)
        i = pl.program_id(1)

        @pl.when(i == 0)
        def _():
            acc_ref[...] = jnp.zeros_like(acc_ref)

        # Global row index of the first row of this (possibly overhanging) block.
        blk_row0 = (c * steps + i) * TB

        def accumulate(masked):
            def body(g, carry):
                off = pl.multiple_of(g * SLAB, SLAB)
                p = p_ref[pl.ds(off, SLAB), :].astype(jnp.float32)
                r = r_ref[pl.ds(off, SLAB), :].astype(jnp.float32)
                d = p - r
                sq = d * d                                        # (SLAB, HW)
                if masked:
                    # Zero rows past the true row count (ragged tail and any
                    # clamped/overhanging block).  jnp.where so garbage in the
                    # padded region can never leak (even NaN/Inf).
                    row = blk_row0 + off + lax.broadcasted_iota(
                        jnp.int32, (SLAB, HW), 0)
                    sq = jnp.where(row < N, sq, 0.0)
                if group == 1:
                    acc_ref[...] += sq
                else:
                    # Free reshape (groups of 8 rows = whole (8,128) tiles);
                    # the axis-0 sum lowers to plain VPU adds.
                    acc_ref[...] += jnp.sum(sq.reshape(group, 8, HW), axis=0)
                return carry

            lax.fori_loop(0, n_slabs, body, None, unroll=unroll)

        if needs_mask:
            full = blk_row0 + TB <= N

            @pl.when(full)
            def _():
                accumulate(False)          # fast path: no masking work

            @pl.when(jnp.logical_not(full))
            def _():
                accumulate(True)           # edge block: mask invalid rows
        else:
            accumulate(False)

        @pl.when(i == pl.num_programs(1) - 1)
        def _():
            # Weight multiply + single cross-lane reduce, once per parallel slot.
            weighted = acc_ref[...] * w_ref[...]                   # (8,HW)*(1,HW)
            out_ref[...] = jnp.sum(weighted).reshape(1, 1, 1)

    return kernel


def rmse_pallas(predict, real, weight_h1):
    """predict, real: (B, C, H, W); weight_h1: (H, 1) float32. Returns scalar f32 RMSE."""
    B, C, H, W = predict.shape
    assert real.shape == predict.shape
    assert weight_h1.shape == (H, 1)

    N = B * C
    HW = H * W
    total_count = N * HW

    p = predict.reshape(N, HW)
    r = real.reshape(N, HW)
    # Pre-expand the (H, 1) weight into a flat, lane-dense (1, H*W) plane that
    # stays resident in VMEM (constant index_map).
    w_plane = jnp.broadcast_to(weight_h1.astype(jnp.float32), (H, W)).reshape(1, HW)

    # ---------------- per-generation block sizing ----------------
    gen = _tpu_generation()
    if gen == "v7x":      # 64 MiB VMEM, ~3.2 TB/s HBM per TC, 2 TensorCores
        target_block_bytes = 10 * 1024 * 1024
        vmem_limit = 52 * 1024 * 1024
        max_p = 2
    elif gen == "v6e":    # 128 MiB VMEM, single TC
        target_block_bytes = 16 * 1024 * 1024
        vmem_limit = 96 * 1024 * 1024
        max_p = 1
    elif gen == "v5e":    # 128 MiB VMEM, single TC
        target_block_bytes = 12 * 1024 * 1024
        vmem_limit = 96 * 1024 * 1024
        max_p = 1
    else:                 # conservative fallback
        target_block_bytes = 8 * 1024 * 1024
        vmem_limit = 48 * 1024 * 1024
        max_p = 1

    # Rows per block, sized by f32-EQUIVALENT bytes (i.e. element count), so a
    # bf16 input doesn't double the f32 working set / VALU work per DMA byte.
    bytes_per_row_f32 = HW * 4
    rows_for_target = max(8, (target_block_bytes // max(1, bytes_per_row_f32)) // 8 * 8)
    # TODO(synk): no tiling along H*W; for very large grids (HW ~ 1e6) the
    # resident weight/accumulator and an 8-row slab would exceed VMEM and an
    # HW grid axis would be required.

    TB = rows_for_target
    if max_p > 1:
        # Relaxed cap: only shrink TB enough to guarantee one block per core.
        TB = min(TB, max(8, _round_up(_cdiv(N, max_p), 8)))
    TB = max(8, min(TB, _round_up(N, 8)))

    n_blocks = _cdiv(N, TB)
    P = max_p if n_blocks >= max_p else 1
    steps = _cdiv(n_blocks, P)
    needs_mask = (P * steps * TB) != N       # ragged tail or overhanging blocks

    SLAB = 32 if TB % 32 == 0 else 8
    n_slabs = TB // SLAB
    unroll = max(1, min(8, n_slabs))

    kernel = _make_rmse_kernel(N=N, TB=TB, HW=HW, steps=steps, SLAB=SLAB,
                               needs_mask=needs_mask, unroll=unroll)

    last_blk = n_blocks - 1

    def data_index_map(c, i):
        # Clamp overhanging block indices (when n_blocks doesn't split evenly
        # across P); the in-kernel row mask zeroes their contribution.
        return (jnp.minimum(c * steps + i, last_blk), 0)

    partials = pl.pallas_call(
        kernel,
        out_shape=jax.ShapeDtypeStruct((P, 1, 1), jnp.float32),
        grid_spec=pltpu.PrefetchScalarGridSpec(
            num_scalar_prefetch=0,
            grid=(P, steps),
            in_specs=[
                pl.BlockSpec((1, HW), lambda c, i: (0, 0)),   # weight (resident)
                pl.BlockSpec((TB, HW), data_index_map),       # predict rows
                pl.BlockSpec((TB, HW), data_index_map),       # real rows
            ],
            out_specs=pl.BlockSpec((1, 1, 1), lambda c, i: (c, 0, 0)),
            scratch_shapes=[pltpu.VMEM((8, HW), jnp.float32)],
        ),
        compiler_params=pltpu.CompilerParams(
            dimension_semantics=("parallel", "arbitrary"),
            vmem_limit_bytes=vmem_limit,
        ),
    )(w_plane, p, r)

    # Tiny finalization in JAX: combine per-core partials, mean, sqrt.
    total = jnp.sum(partials)
    return jnp.sqrt(total / jnp.float32(total_count))


def make_latitude_weight(H):
    # TODO(synk): the original module torch.load()s the latitude grid from disk;
    # it is synthesized here as a deterministic linspace of latitudes instead.
    lat = jnp.linspace(-88.5, 88.5, H, dtype=jnp.float32)        # degrees
    w = jnp.cos(lat / 180.0 * jnp.pi)
    w = w / jnp.mean(w)
    return w.reshape(H, 1)                                        # matches weight.unsqueeze(1)


if __name__ == "__main__":
    B, C, H, W = 2, 4, 16, 16
    key = jax.random.PRNGKey(0)
    k1, k2 = jax.random.split(key)
    predict = jax.random.normal(k1, (B, C, H, W), dtype=jnp.float32)
    real = jax.random.normal(k2, (B, C, H, W), dtype=jnp.float32)

    weight = make_latitude_weight(H)

    out = rmse_pallas(predict, real, weight)
    out = jax.block_until_ready(out)

    # Pure-JAX reference for correctness.
    ref = jnp.sqrt(jnp.mean(((predict.astype(jnp.float32)
                              - real.astype(jnp.float32)) ** 2) * weight))
    assert jnp.allclose(out, ref, rtol=1e-5, atol=1e-6), (out, ref)

    print("KERNEL_OK")
</pallas_src>

<mosaic_0001>
module attributes {stable_mosaic.version = 11 : i64} {
  func.func @kernel(%arg0: i32, %arg1: i32, %arg2: memref<1x256xf32, #tpu.memory_space<vmem>>, %arg3: memref<8x256xf32, #tpu.memory_space<vmem>>, %arg4: memref<8x256xf32, #tpu.memory_space<vmem>>, %arg5: memref<1x1x1xf32, #tpu.memory_space<vmem>>, %arg6: memref<8x256xf32, #tpu.memory_space<vmem>>) attributes {dimension_semantics = [#tpu.dimension_semantics<parallel>, #tpu.dimension_semantics<arbitrary>], iteration_bounds = array<i64: 1, 1>, scalar_prefetch = 0 : i64, scratch_operands = 1 : i64, tpu.core_type = #tpu.core_type<tc>, window_params = [{pipeline_mode = #tpu.pipeline_mode<synchronous>, transform_indices = @transform_0, window_bounds = array<i64: 1, 256>}, {transform_indices = @transform_1, window_bounds = array<i64: 8, 256>}, {transform_indices = @transform_2, window_bounds = array<i64: 8, 256>}, {transform_indices = @transform_3, window_bounds = array<i64: 1, 1, 1>}]} {
    %c0_i32 = arith.constant 0 : i32
    %0 = arith.cmpi eq, %arg1, %c0_i32 : i32
    %1 = arith.extui %0 : i1 to i32
    %c0_i32_0 = arith.constant 0 : i32
    %2 = arith.cmpi ne, %1, %c0_i32_0 : i32
    scf.if %2 {
      %cst = arith.constant 0.000000e+00 : f32
      %17 = vector.broadcast %cst : f32 to vector<8x256xf32>
      %c0_9 = arith.constant 0 : index
      %c0_10 = arith.constant 0 : index
      %18 = vector.load %arg6[%c0_9, %c0_10] : memref<8x256xf32, #tpu.memory_space<vmem>>, vector<8x256xf32>
      tpu.vector_store %arg6[%c0_9, %c0_10], %17 {strides = array<i32>} : memref<8x256xf32, #tpu.memory_space<vmem>>, vector<8x256xf32>,
    } else {
    }
    %c0_i32_1 = arith.constant 0 : i32
    %c8_i32 = arith.constant 8 : i32
    %3 = arith.muli %c0_i32_1, %c8_i32 : i32
    %4 = tpu.assume_multiple %3, 8 : i32
    %5 = arith.index_cast %4 : i32 to index
    %c0 = arith.constant 0 : index
    %6 = vector.load %arg3[%5, %c0] : memref<8x256xf32, #tpu.memory_space<vmem>>, vector<8x256xf32>
    %7 = arith.index_cast %4 : i32 to index
    %c0_2 = arith.constant 0 : index
    %8 = vector.load %arg4[%7, %c0_2] : memref<8x256xf32, #tpu.memory_space<vmem>>, vector<8x256xf32>
    %9 = arith.subf %6, %8 : vector<8x256xf32>
    %10 = arith.mulf %9, %9 : vector<8x256xf32>
    %c0_3 = arith.constant 0 : index
    %c0_4 = arith.constant 0 : index
    %11 = vector.load %arg6[%c0_3, %c0_4] : memref<8x256xf32, #tpu.memory_space<vmem>>, vector<8x256xf32>
    %12 = arith.addf %11, %10 : vector<8x256xf32>
    %c0_5 = arith.constant 0 : index
    %c0_6 = arith.constant 0 : index
    %13 = vector.load %arg6[%c0_5, %c0_6] : memref<8x256xf32, #tpu.memory_space<vmem>>, vector<8x256xf32>
    tpu.vector_store %arg6[%c0_5, %c0_6], %12 {strides = array<i32>} : memref<8x256xf32, #tpu.memory_space<vmem>>, vector<8x256xf32>,
    %c1_i32 = arith.constant 1 : i32
    %c0_i32_7 = arith.constant 0 : i32
    %14 = arith.cmpi eq, %arg1, %c0_i32_7 : i32
    %15 = arith.extui %14 : i1 to i32
    %c0_i32_8 = arith.constant 0 : i32
    %16 = arith.cmpi ne, %15, %c0_i32_8 : i32
    scf.if %16 {
      %c0_9 = arith.constant 0 : index
      %c0_10 = arith.constant 0 : index
      %17 = vector.load %arg6[%c0_9, %c0_10] : memref<8x256xf32, #tpu.memory_space<vmem>>, vector<8x256xf32>
      %c0_11 = arith.constant 0 : index
      %c0_12 = arith.constant 0 : index
      %18 = vector.load %arg2[%c0_11, %c0_12] : memref<1x256xf32, #tpu.memory_space<vmem>>, vector<1x256xf32>
      %19 = vector.broadcast %18 : vector<1x256xf32> to vector<8x256xf32>
      %20 = arith.mulf %17, %19 : vector<8x256xf32>
      %21 = vector.shape_cast %20 : vector<8x256xf32> to vector<1x8x256xf32>
      %cst = arith.constant dense<0.000000e+00> : vector<1xf32>
      %22 = vector.multi_reduction <add>, %21, %cst [1, 2] : vector<1x8x256xf32> to vector<1xf32>
      %23 = vector.shape_cast %22 : vector<1xf32> to vector<1x1x1xf32>
      %24 = vector.extract %23[0, 0, 0] : f32 from vector<1x1x1xf32>
      %25 = vector.broadcast %24 : f32 to vector<1x1x1xf32>
      %c0_13 = arith.constant 0 : index
      %c0_14 = arith.constant 0 : index
      %c0_15 = arith.constant 0 : index
      %26 = vector.load %arg5[%c0_13, %c0_14, %c0_15] : memref<1x1x1xf32, #tpu.memory_space<vmem>>, vector<1x1x1xf32>
      tpu.vector_store %arg5[%c0_13, %c0_14, %c0_15], %25 {strides = array<i32>} : memref<1x1x1xf32, #tpu.memory_space<vmem>>, vector<1x1x1xf32>,
    } else {
    }
    return
  }
  func.func @transform_0(%arg0: i32, %arg1: i32) -> (i32, i32) {
    %c0_i32 = arith.constant 0 : i32
    %c0_i32_0 = arith.constant 0 : i32
    %c0_i32_1 = arith.constant 0 : i32
    return %c0_i32, %c0_i32_0 : i32, i32
  }
  func.func @transform_1(%arg0: i32, %arg1: i32) -> (i32, i32) {
    %c1_i32 = arith.constant 1 : i32
    %0 = arith.muli %arg0, %c1_i32 : i32
    %1 = arith.addi %0, %arg1 : i32
    %c0_i32 = arith.constant 0 : i32
    %2 = arith.minsi %1, %c0_i32 : i32
    %c0_i32_0 = arith.constant 0 : i32
    %c0_i32_1 = arith.constant 0 : i32
    return %2, %c0_i32_0 : i32, i32
  }
  func.func @transform_2(%arg0: i32, %arg1: i32) -> (i32, i32) {
    %c1_i32 = arith.constant 1 : i32
    %0 = arith.muli %arg0, %c1_i32 : i32
    %1 = arith.addi %0, %arg1 : i32
    %c0_i32 = arith.constant 0 : i32
    %2 = arith.minsi %1, %c0_i32 : i32
    %c0_i32_0 = arith.constant 0 : i32
    %c0_i32_1 = arith.constant 0 : i32
    return %2, %c0_i32_0 : i32, i32
  }
  func.func @transform_3(%arg0: i32, %arg1: i32) -> (i32, i32, i32) {
    %c0_i32 = arith.constant 0 : i32
    %c0_i32_0 = arith.constant 0 : i32
    %c0_i32_1 = arith.constant 0 : i32
    return %arg0, %c0_i32, %c0_i32_0 : i32, i32, i32
  }
}

</mosaic_0001>

<bundles_post_ra>
// kernel: tpu_custom_call.1
= control target key start
LH: loop header
LB: loop body
LE: loop exit
PB: predicated region body
PF: predicated region fallthrough
CT: control target
= control target key end

     0   :  { %8 = vsyncpa [#allocation4], 0  ;;  %s317_s0 = inlined_call_operand.hbm [shape: f32[1,256], index: 0, kind: input, shape index: {}]   ;;  %s318_s1 = inlined_call_operand.hbm [shape: f32[8,256], index: 1, kind: input, shape index: {}]   ;;  %s319_s2 = inlined_call_operand.hbm [shape: f32[8,256], index: 2, kind: input, shape index: {}]   ;;  %s320_s3 = inlined_call_operand.hbm [shape: f32[1,1,1], index: 3, kind: output, shape index: {}]  }
   0x1   :  { %9 = vsyncpa [#allocation7], 0 }
   0x2   :  { %10 = vsyncpa [#allocation5], 0  ;;  %s245_s12 = smov [#allocation6]   ;;  %s246_s14 = smov [#allocation3]  }
   0x3   :  { %s33_s13 = sshll.u32 %s245_s12, 4  ;;  %s17_s15 = sshll.u32 %s246_s14, 4  ;;  %s34_s13 = int_to_ptr.vmem [resolvable:$true] %s33_s13  ;;  %s18_s15 = int_to_ptr.vmem [resolvable:$true] %s17_s15 }
   0x4   :  { %s151_s18 = scalar_lea.hbm %s318_s1, 256 }
   0x5   :  { %p152_p0 = scmp.ne.s32.totalorder %s318_s1, %s151_s18  ;;  %p155_p1 = scmp.lt.u32.totalorder %s151_s18, %s318_s1 }
   0x7   :  { %p157_p2 = pnand %p155_p1, %p152_p0 }
   0x9   :  { %160 = shalt.err (!%p157_p2)
}
   0xa   :  { %s161_s23 = scalar_lea.vmem %s34_s13, 256  ;;  %p166_p4 = scmp.lt.s32.totalorder %s34_s13, %s34_s13 }
   0xb   :  { %p162_p3 = scmp.ne.s32.totalorder %s34_s13, %s161_s23  ;;  %p167_p5 = scmp.lt.s32.totalorder %s161_s23, %s161_s23 }
   0xd   :  { %p168_p6 = por %p167_p5, %p166_p4 }
   0xf   :  { %p169_p7 = pnand %p168_p6, %p162_p3 }
  0x11   :  { %172 = shalt.err (!%p169_p7)
}
  0x12   :  { %36 = dma.hbm_to_vmem [thread:$0]  %s318_s1, 256, %s34_s13, [#allocation7]  }
  0x13   :  { %s173_s28 = scalar_lea.hbm %s317_s0, 32 }
  0x14   :  { %p174_p8 = scmp.ne.s32.totalorder %s317_s0, %s173_s28  ;;  %p177_p9 = scmp.lt.u32.totalorder %s173_s28, %s317_s0 }
  0x16   :  { %p179_p10 = pnand %p177_p9, %p174_p8 }
  0x18   :  { %182 = shalt.err (!%p179_p10)
}
  0x19   :  { %s183_s6 = scalar_lea.vmem %s18_s15, 32  ;;  %p188_p12 = scmp.lt.s32.totalorder %s18_s15, %s18_s15 }
  0x1a   :  { %p184_p11 = scmp.ne.s32.totalorder %s18_s15, %s183_s6  ;;  %p189_p13 = scmp.lt.s32.totalorder %s183_s6, %s183_s6 }
  0x1c   :  { %p190_p0 = por %p189_p13, %p188_p12 }
  0x1e   :  { %p191_p1 = pnand %p190_p0, %p184_p11 }
  0x20   :  { %194 = shalt.err (!%p191_p1)
}
  0x21   :  { %20 = dma.hbm_to_vmem [thread:$0]  %s317_s0, 32, %s18_s15, [#allocation4]  }
  0x22   :  { %s247_s8 = smov [#allocation8]   ;;  %s195_s12 = scalar_lea.hbm %s319_s2, 256 }
  0x23   :  { %s49_s9 = sshll.u32 %s247_s8, 4  ;;  %p196_p2 = scmp.ne.s32.totalorder %s319_s2, %s195_s12  ;;  %s50_s9 = int_to_ptr.vmem [resolvable:$true] %s49_s9 }
  0x24   :  { %p199_p3 = scmp.lt.u32.totalorder %s195_s12, %s319_s2 }
  0x26   :  { %p201_p4 = pnand %p199_p3, %p196_p2 }
  0x28   :  { %204 = shalt.err (!%p201_p4)
}
  0x29   :  { %s205_s18 = scalar_lea.vmem %s50_s9, 256  ;;  %p210_p6 = scmp.lt.s32.totalorder %s50_s9, %s50_s9 }
  0x2a   :  { %p206_p5 = scmp.ne.s32.totalorder %s50_s9, %s205_s18  ;;  %p211_p7 = scmp.lt.s32.totalorder %s205_s18, %s205_s18 }
  0x2c   :  { %p212_p8 = por %p211_p7, %p210_p6 }
  0x2e   :  { %p213_p9 = pnand %p212_p8, %p206_p5 }
  0x30   :  { %216 = shalt.err (!%p213_p9)
}
  0x31   :  { %52 = dma.hbm_to_vmem [thread:$0]  %s319_s2, 256, %s50_s9, [#allocation7]  }
  0x32   :  { %239 = dma.done.wait [#allocation4], 32  }
  0x33   :  { %240 = vsyncadd [#allocation4], 4294967264 }
  0x34   :  { %241 = dma.done.wait [#allocation7], 512  }
  0x35   :  { %242 = vsyncadd [#allocation7], 4294966784  ;;  %v100_v0 = vlaneseq  ;;  %v77_v4 = vld [vmem:[#allocation6] sm:$0xff]  ;;  %v78_v5 = vld [vmem:[#allocation6 + $0x8] sm:$0xff]  ;;  %s248_s2 = smov [#allocation9]   ;;  %vm123_vm0 = vcmask 0  }
  0x36   :  { %v81_v6 = vld [vmem:[#allocation8] sm:$0xff]  ;;  %v82_v7 = vld [vmem:[#allocation8 + $0x8] sm:$0xff]  ;;  %s131_s19 = sshll.u32 %s248_s2, 4  ;;  %s132_s19 = int_to_ptr.vmem [resolvable:$true] %s131_s19 }
  0x37   :  { %v101_v1 = vshrl.u32 %v100_v0, 7  ;;  %v83_v8 = vsub.f32 %v77_v4, %v81_v6  ;;  %v98_v9 = vld [vmem:[#allocation3] sm:$0x3]  ;;  %v84_v10 = vsub.f32 %v78_v5, %v82_v7  ;;  %s217_s21 = scalar_lea.vmem %s132_s19, 16  ;;  %s221_s22 = scalar_lea.vmem %s132_s19, 32 }
  0x38   :  { %p218_p10 = scmp.ne.s32.totalorder %s132_s19, %s217_s21  ;;  %p222_p11 = scmp.lt.s32.totalorder %s132_s19, %s132_s19 }
  0x39   :  { %v102_v2 = vsub.s32 0, %v101_v1  ;;  %v106_v3 = vsub.s32 1, %v101_v1  ;;  %v85_v13 = vmul.f32 %v83_v8, %v83_v8  ;;  %v86_v14 = vmul.f32 %v84_v10, %v84_v10  ;;  %p223_p12 = scmp.lt.s32.totalorder %s221_s22, %s217_s21 }
  0x3b   :  { %v103_v11 = vrot.slane %v98_v9, %v102_v2  ;;  %v107_v12 = vrot.slane %v98_v9, %v106_v3  ;;  %p224_p13 = por %p223_p12, %p222_p11 }
  0x3d   :  { %v110_v15 = vmul.f32 %v103_v11, %v85_v13  ;;  %v111_v16 = vmul.f32 %v107_v12, %v86_v14  ;;  %p225_p0 = pnand %p224_p13, %p218_p10 }
  0x3f   :  { %v112_v17 = vadd.f32 %v111_v16, %v110_v15 }
  0x41   :  { %113 = vadd.xlane.f32.xlu0 %v112_v17 }
  0xce   :  { %v114_v18 = vpop.xlane.xlu0 %113 }
  0xcf   :  { %v115_v19 = vrot.slane %v114_v18, 4 }
  0xd1   :  { %v116_v20 = vadd.f32 %v115_v19, %v114_v18 }
  0xd3   :  { %v117_v21 = vrot.slane %v116_v20, 2 }
  0xd5   :  { %v118_v22 = vadd.f32 %v117_v21, %v116_v20 }
  0xd7   :  { %v119_v23 = vrot.slane %v118_v22, 1 }
  0xd9   :  { %v120_v24 = vadd.f32 %v119_v23, %v118_v22 }
  0xdb   :  { %145 = vpush %v120_v24 }
 0x10c   :  { %s146_s20 = spop %145 }
 0x10d   :  { %v122_v25 = vstv %s146_s20 }
 0x10e   :  { %124 = vst.msk [vmem:[#allocation9] sm:$0x1] %vm123_vm0, %v122_v25 }
 0x10f   :  { %228 = shalt.err (!%p225_p0)
}
 0x110   :  { %s229_s25 = scalar_lea.hbm %s320_s3, 16 }
 0x111   :  { %p230_p1 = scmp.ne.s32.totalorder %s320_s3, %s229_s25  ;;  %p233_p2 = scmp.lt.u32.totalorder %s229_s25, %s320_s3 }
 0x113   :  { %p235_p3 = pnand %p233_p2, %p230_p1 }
 0x115   :  { %238 = shalt.err (!%p235_p3)
}
 0x116   :  { %134 = dma.vmem_to_hbm [thread:$0]  %s132_s19, 16, %s320_s3, [#allocation5]  }
 0x117   :  { %243 = dma.done.wait [#allocation5], 16  }
 0x118   :  { %244 = vsyncadd [#allocation5], 4294967280 }
 0x119   :  { %138 = vsyncpa [#allocation4], 1 }
 0x11a   :  { %139 = vsyncpa [#allocation7], 1 }
 0x11b   :  { %140 = vsyncpa [#allocation5], 1 }

</bundles_post_ra>
